<compile_context>
chip_gen: v7x
topology: tpu7x:2x2x1
jax: 0.10.0
libtpu: 0.0.40
codegen_flags: <defaults>
</compile_context>

<pallas_src>
import math

import numpy as np

import jax
import jax.numpy as jnp
from jax.experimental import pallas as pl
from jax.experimental.pallas import tpu as pltpu

# ----------------------------- config (small) --------------------------------
BATCH = 2
SEQ = 8
HIDDEN = 32
N_HEADS = 4
N_KV_HEADS = 2
HEAD_DIM = HIDDEN // N_HEADS          # 8
HD2 = HEAD_DIM // 2                   # 4
GROUP = N_HEADS // N_KV_HEADS         # 2
INTERMEDIATE = 64
EPS = 1e-5
ROPE_BASE = 500000.0

# derived layout constants
BS = BATCH * SEQ                      # 16  (flattened rows)
QD = N_HEADS * HEAD_DIM               # 32  (q width)
KVD = N_KV_HEADS * HEAD_DIM           # 16  (k/v width)
NH_BS = N_HEADS * BS                  # 64
OFF_K = QD                            # 32
OFF_V = QD + KVD                      # 48
OFF_QROT = QD + 2 * KVD               # 64
OFF_KROT = 2 * QD + 2 * KVD           # 96
QKV_W = 2 * QD + 3 * KVD              # 112 (fused projection width, unpadded)
QKV_PAD = 128                         # lane-dense padded width
WPROJ_W = QKV_PAD + 2 * INTERMEDIATE  # 256 (packed qkv|rot|pad|gate|up slab)
WOUT_R = QD + INTERMEDIATE            # 96  (packed o_proj ; down_proj slab rows)
MASK_W = QD + BS                      # 48  (head mask | additive bias)


def _build_masks():
    """Constant (NH_BS, QD+BS) buffer: [0/1 head mask | additive 0/-1e30 bias]."""
    row = np.arange(NH_BS)[:, None]
    # head mask: 1 where the column's head matches the row-block's head.
    # (identical to the per-head gather mask, so it is reused for the gather)
    qmask = (row // BS == (np.arange(QD)[None, :] // HEAD_DIM)).astype(np.float32)
    # causal + same-batch additive bias (finite large negative; never -inf)
    rr = row % BS
    cc = np.arange(BS)[None, :]
    valid = ((rr // SEQ) == (cc // SEQ)) & ((rr % SEQ) >= (cc % SEQ))
    bias = np.where(valid, 0.0, -1e30).astype(np.float32)
    return np.concatenate([qmask, bias], axis=1)          # (64, 48)


def decoder_layer_kernel(x_ref, rope_ref, wproj_ref, wout_ref, mask_ref, o_ref):
    bf16 = jnp.bfloat16
    f32 = jnp.float32

    x = x_ref[...]                                         # (BS, H) fp32

    # ---- input RMSNorm (gain g1 pre-folded into wproj rows) -----------------
    var = jnp.mean(x * x, axis=-1, keepdims=True)
    h = x * jax.lax.rsqrt(var + EPS)

    # ---- fused {q|k|v|q_rot|k_rot|pad} projection: ONE lane-dense MXU push --
    qkv = jnp.dot(h.astype(bf16), wproj_ref[:, :QKV_PAD],
                  preferred_element_type=f32)              # (BS, 128)

    # ---- RoPE as two full-width FMAs (rot columns precomputed in weights) ---
    cos = rope_ref[:, :QD]                                 # (BS, QD)  [c, c]/head
    sin = rope_ref[:, QD:2 * QD]                           # (BS, QD)  [-s, s]/head
    q = qkv[:, 0:QD] * cos + qkv[:, OFF_QROT:OFF_QROT + QD] * sin
    k = (qkv[:, OFF_K:OFF_K + KVD] * cos[:, :KVD]
         + qkv[:, OFF_KROT:OFF_KROT + KVD] * sin[:, :KVD])
    v = qkv[:, OFF_V:OFF_V + KVD]

    # ---- GQA expansion by lane tiling (query heads pre-permuted: j -> j%nkv) -
    k_rep = jnp.concatenate([k] * GROUP, axis=1)           # (BS, QD)
    v_rep = jnp.concatenate([v] * GROUP, axis=1)           # (BS, QD)

    # ---- block-diagonal-over-heads attention: 2 bf16 MXU pushes --------------
    # constant 0/1 head mask (one vmul); score scale already folded into wq
    q_exp = jnp.concatenate([q] * N_HEADS, axis=0) * mask_ref[:, :QD]  # (NH_BS, QD)

    s = jax.lax.dot_general(q_exp.astype(bf16), k_rep.astype(bf16),
                            (((1,), (1,)), ((), ())),
                            preferred_element_type=f32)    # (NH_BS, BS)
    s = s + mask_ref[:, QD:QD + BS]                        # causal+batch bias (vadd)

    m = jnp.max(s, axis=-1, keepdims=True)
    e = jnp.exp(s - m)
    p = e * pl.reciprocal(jnp.sum(e, axis=-1, keepdims=True), approx=True)

    pv = jnp.dot(p.astype(bf16), v_rep.astype(bf16),
                 preferred_element_type=f32)               # (NH_BS, QD)

    # ---- gather per-head diagonal blocks: 4 constant-mask FMAs ---------------
    attn = jnp.zeros((BS, QD), f32)
    for hh in range(N_HEADS):                              # static sublane slices
        attn = attn + pv[hh * BS:(hh + 1) * BS, :] * mask_ref[hh * BS:(hh + 1) * BS, :QD]

    # ---- o_proj + residual ----------------------------------------------------
    x1 = x + jnp.dot(attn.astype(bf16), wout_ref[0:QD, :],
                     preferred_element_type=f32)

    # ---- post-attention RMSNorm (gain g2 pre-folded into gate|up rows) -------
    var2 = jnp.mean(x1 * x1, axis=-1, keepdims=True)
    h2 = x1 * jax.lax.rsqrt(var2 + EPS)

    # ---- fused SwiGLU gate|up (lane-dense 128-wide result) + down proj -------
    gu = jnp.dot(h2.astype(bf16), wproj_ref[:, QKV_PAD:],
                 preferred_element_type=f32)               # (BS, 128)
    gate = gu[:, :INTERMEDIATE]
    up = gu[:, INTERMEDIATE:]
    act = gate * jax.nn.sigmoid(gate) * up                 # silu(gate) * up, fp32
    mlp = jnp.dot(act.astype(bf16), wout_ref[QD:QD + INTERMEDIATE, :],
                  preferred_element_type=f32)

    o_ref[...] = x1 + mlp


@jax.jit
def decoder_layer(x, cos_half, sin_half, wq, wk, wv, wo, wg, wu, wd, g1, g2):
    B, S, H = x.shape
    bf16 = jnp.bfloat16

    # ---- one-time weight packing (wrapper-side, plain XLA) -------------------
    # permute query heads so head j uses kv head j % n_kv (lets GQA expansion be
    # a simple lane-tile of k/v inside the kernel)
    perm = jnp.array([(j % N_KV_HEADS) * GROUP + j // N_KV_HEADS
                      for j in range(N_HEADS)], dtype=jnp.int32)
    wq_p = wq.reshape(H, N_HEADS, HEAD_DIM)[:, perm, :].reshape(H, QD)
    wo_p = wo.reshape(N_HEADS, HEAD_DIM, H)[perm].reshape(QD, H)
    # "rotated" projection columns: per-head half swap -> kernel RoPE is 2 FMAs
    wq_rot = wq_p.reshape(H, N_HEADS, 2, HD2)[:, :, ::-1, :].reshape(H, QD)
    wk_rot = wk.reshape(H, N_KV_HEADS, 2, HD2)[:, :, ::-1, :].reshape(H, KVD)

    # fold 1/sqrt(head_dim) score scale into the q / q_rot columns
    scale = 1.0 / math.sqrt(HEAD_DIM)
    w_qkv = jnp.concatenate([wq_p * scale, wk, wv, wq_rot * scale, wk_rot],
                            axis=1)                                  # (H, 112)
    # fold RMSNorm gains into weight rows (g applied before the bf16 cast)
    w_qkv = w_qkv * g1[0][:, None]
    w_qkv = jnp.pad(w_qkv, ((0, 0), (0, QKV_PAD - QKV_W)))           # (H, 128)
    w_gu = jnp.concatenate([wg, wu], axis=1) * g2[0][:, None]        # (H, 128)
    w_proj = jnp.concatenate([w_qkv, w_gu], axis=1).astype(bf16)     # (H, 256)
    w_out = jnp.concatenate([wo_p, wd], axis=0).astype(bf16)         # (96, H)

    # ---- RoPE tables: full head width, sign baked into sin, batch-tiled ------
    cos_head = jnp.concatenate([cos_half, cos_half], axis=1)         # (S, hd)
    sin_head = jnp.concatenate([-sin_half, sin_half], axis=1)        # (S, hd)
    rope = jnp.concatenate([jnp.tile(cos_head, (B, N_HEADS)),
                            jnp.tile(sin_head, (B, N_HEADS))],
                           axis=1)                                   # (BS, 2*QD)

    masks = jnp.asarray(_build_masks())                              # (64, 48)
    x_flat = x.reshape(B * S, H)
    zero2 = lambda i: (0, 0)

    out = pl.pallas_call(
        decoder_layer_kernel,
        out_shape=jax.ShapeDtypeStruct((B * S, H), jnp.float32),
        grid=(1,),                                   # single step: whole slab
        in_specs=[
            pl.BlockSpec((BS, H), zero2),            # x (flattened)
            pl.BlockSpec((BS, 2 * QD), zero2),       # packed cos|sin table
            pl.BlockSpec((H, WPROJ_W), zero2),       # packed qkv|rot|pad|gate|up
            pl.BlockSpec((WOUT_R, H), zero2),        # packed o_proj ; down_proj
            pl.BlockSpec((NH_BS, MASK_W), zero2),    # packed head mask | bias
        ],
        out_specs=pl.BlockSpec((BS, H), zero2),
        compiler_params=pltpu.CompilerParams(
            dimension_semantics=("arbitrary",)),
    )(x_flat, rope, w_proj, w_out, masks)

    return out.reshape(B, S, H)


# ------------------------------ pure-JAX reference ---------------------------
def reference(x, cos, sin, wq, wk, wv, wo, wg, wu, wd, g1, g2):
    def rms(z, g):
        var = jnp.mean(z * z, axis=-1, keepdims=True)
        return z * jax.lax.rsqrt(var + EPS) * g

    def rope(z):  # z: (B, S, nh, hd)
        z1, z2 = z[..., :HD2], z[..., HD2:]
        c = cos[None, :, None, :]
        s = sin[None, :, None, :]
        return jnp.concatenate([z1 * c - z2 * s, z2 * c + z1 * s], axis=-1)

    B, S, H = x.shape
    h = rms(x, g1[0])
    q = (h @ wq).reshape(B, S, N_HEADS, HEAD_DIM)
    k = (h @ wk).reshape(B, S, N_KV_HEADS, HEAD_DIM)
    v = (h @ wv).reshape(B, S, N_KV_HEADS, HEAD_DIM)
    q, k = rope(q), rope(k)
    group = N_HEADS // N_KV_HEADS
    k = jnp.repeat(k, group, axis=2)
    v = jnp.repeat(v, group, axis=2)
    q = q.transpose(0, 2, 1, 3)
    k = k.transpose(0, 2, 1, 3)
    v = v.transpose(0, 2, 1, 3)
    s = jnp.einsum("bhqd,bhkd->bhqk", q, k) / math.sqrt(HEAD_DIM)
    mask = jnp.tril(jnp.ones((S, S), dtype=bool))
    s = jnp.where(mask, s, -jnp.inf)
    p = jax.nn.softmax(s, axis=-1)
    o = jnp.einsum("bhqk,bhkd->bhqd", p, v).transpose(0, 2, 1, 3).reshape(B, S, H)
    x1 = x + o @ wo
    h2 = rms(x1, g2[0])
    gate = h2 @ wg
    mlp = (jax.nn.silu(gate) * (h2 @ wu)) @ wd
    return x1 + mlp


# ----------------------------------- main -------------------------------------
if __name__ == "__main__":
    key = jax.random.PRNGKey(0)
    keys = jax.random.split(key, 8)

    x = jax.random.normal(keys[0], (BATCH, SEQ, HIDDEN), dtype=jnp.float32)

    def init(k, shape):
        return 0.05 * jax.random.normal(k, shape, dtype=jnp.float32)

    wq = init(keys[1], (HIDDEN, N_HEADS * HEAD_DIM))
    wk = init(keys[2], (HIDDEN, N_KV_HEADS * HEAD_DIM))
    wv = init(keys[3], (HIDDEN, N_KV_HEADS * HEAD_DIM))
    wo = init(keys[4], (HIDDEN, HIDDEN))
    wg = init(keys[5], (HIDDEN, INTERMEDIATE))
    wu = init(keys[6], (HIDDEN, INTERMEDIATE))
    wd = init(keys[7], (INTERMEDIATE, HIDDEN))
    g1 = jnp.ones((1, HIDDEN), dtype=jnp.float32)   # TritonRMSNorm weight = ones
    g2 = jnp.ones((1, HIDDEN), dtype=jnp.float32)

    # RoPE tables (already the cos[:, :head_dim//2] / sin[:, :head_dim//2] slice)
    inv_freq = 1.0 / (ROPE_BASE ** (jnp.arange(0, HEAD_DIM, 2, dtype=jnp.float32)
                                    / HEAD_DIM))
    pos = jnp.arange(SEQ, dtype=jnp.float32)[:, None]
    angles = pos * inv_freq[None, :]
    cos_half = jnp.cos(angles)
    sin_half = jnp.sin(angles)

    out = decoder_layer(x, cos_half, sin_half, wq, wk, wv, wo, wg, wu, wd, g1, g2)
    out = jax.block_until_ready(out)

    ref = reference(x, cos_half, sin_half, wq, wk, wv, wo, wg, wu, wd, g1, g2)
    # bf16 MXU operands + approx reciprocal need a looser tolerance than the
    # all-fp32 reference; observed error is O(1e-3).
    assert jnp.allclose(out, ref, atol=2e-2, rtol=2e-2), (
        float(jnp.max(jnp.abs(out - ref))))

    print("KERNEL_OK")
</pallas_src>

<mosaic_0001>
module attributes {stable_mosaic.version = 11 : i64} {
  func.func @decoder_layer_kernel(%arg0: i32, %arg1: memref<16x32xf32, #tpu.memory_space<vmem>>, %arg2: memref<16x64xf32, #tpu.memory_space<vmem>>, %arg3: memref<32x256xbf16, #tpu.memory_space<vmem>>, %arg4: memref<96x32xbf16, #tpu.memory_space<vmem>>, %arg5: memref<64x48xf32, #tpu.memory_space<vmem>>, %arg6: memref<16x32xf32, #tpu.memory_space<vmem>>) attributes {dimension_semantics = [#tpu.dimension_semantics<arbitrary>], iteration_bounds = array<i64: 1>, scalar_prefetch = 0 : i64, scratch_operands = 0 : i64, tpu.core_type = #tpu.core_type<tc>, window_params = [{pipeline_mode = #tpu.pipeline_mode<synchronous>, transform_indices = @transform_0, window_bounds = array<i64: 16, 32>}, {pipeline_mode = #tpu.pipeline_mode<synchronous>, transform_indices = @transform_1, window_bounds = array<i64: 16, 64>}, {pipeline_mode = #tpu.pipeline_mode<synchronous>, transform_indices = @transform_2, window_bounds = array<i64: 32, 256>}, {pipeline_mode = #tpu.pipeline_mode<synchronous>, transform_indices = @transform_3, window_bounds = array<i64: 96, 32>}, {pipeline_mode = #tpu.pipeline_mode<synchronous>, transform_indices = @transform_4, window_bounds = array<i64: 64, 48>}, {pipeline_mode = #tpu.pipeline_mode<synchronous>, transform_indices = @transform_5, window_bounds = array<i64: 16, 32>}]} {
    %c0 = arith.constant 0 : index
    %c0_0 = arith.constant 0 : index
    %0 = vector.load %arg1[%c0, %c0_0] : memref<16x32xf32, #tpu.memory_space<vmem>>, vector<16x32xf32>
    %1 = arith.mulf %0, %0 : vector<16x32xf32>
    %cst = arith.constant dense<0.000000e+00> : vector<16xf32>
    %2 = vector.multi_reduction <add>, %1, %cst [1] : vector<16x32xf32> to vector<16xf32>
    %3 = vector.shape_cast %2 : vector<16xf32> to vector<16x1xf32>
    %cst_1 = arith.constant 3.200000e+01 : f32
    %4 = vector.broadcast %cst_1 : f32 to vector<16x1xf32>
    %5 = arith.divf %3, %4 : vector<16x1xf32>
    %cst_2 = arith.constant 9.99999974E-6 : f32
    %6 = vector.broadcast %cst_2 : f32 to vector<16x1xf32>
    %7 = arith.addf %5, %6 : vector<16x1xf32>
    %8 = math.rsqrt %7 : vector<16x1xf32>
    %9 = vector.broadcast %8 : vector<16x1xf32> to vector<16x32xf32>
    %10 = arith.mulf %0, %9 : vector<16x32xf32>
    %11 = arith.truncf %10 : vector<16x32xf32> to vector<16x32xbf16>
    %c0_3 = arith.constant 0 : index
    %c0_4 = arith.constant 0 : index
    %12 = vector.load %arg3[%c0_3, %c0_4] : memref<32x256xbf16, #tpu.memory_space<vmem>>, vector<32x128xbf16>
    %cst_5 = arith.constant dense<0.000000e+00> : vector<16x128xf32>
    %13 = tpu.matmul %11, %12, %cst_5 {dimension_numbers = #tpu.dot_dimension_numbers<[1], [0], [0], [1], [0, 0, 1, 1], [], []>} : vector<16x32xbf16>, vector<32x128xbf16>, vector<16x128xf32> -> vector<16x128xf32>
    %c0_6 = arith.constant 0 : index
    %c0_7 = arith.constant 0 : index
    %14 = vector.load %arg2[%c0_6, %c0_7] : memref<16x64xf32, #tpu.memory_space<vmem>>, vector<16x32xf32>
    %c0_8 = arith.constant 0 : index
    %c32 = arith.constant 32 : index
    %15 = vector.load %arg2[%c0_8, %c32] : memref<16x64xf32, #tpu.memory_space<vmem>>, vector<16x32xf32>
    %16 = vector.extract_strided_slice %13 {offsets = [0, 0], sizes = [16, 32], strides = [1, 1]} : vector<16x128xf32> to vector<16x32xf32>
    %17 = arith.mulf %16, %14 : vector<16x32xf32>
    %18 = vector.extract_strided_slice %13 {offsets = [0, 64], sizes = [16, 32], strides = [1, 1]} : vector<16x128xf32> to vector<16x32xf32>
    %19 = arith.mulf %18, %15 : vector<16x32xf32>
    %20 = arith.addf %17, %19 : vector<16x32xf32>
    %21 = vector.extract_strided_slice %13 {offsets = [0, 32], sizes = [16, 16], strides = [1, 1]} : vector<16x128xf32> to vector<16x16xf32>
    %22 = vector.extract_strided_slice %14 {offsets = [0, 0], sizes = [16, 16], strides = [1, 1]} : vector<16x32xf32> to vector<16x16xf32>
    %23 = arith.mulf %21, %22 : vector<16x16xf32>
    %24 = vector.extract_strided_slice %13 {offsets = [0, 96], sizes = [16, 16], strides = [1, 1]} : vector<16x128xf32> to vector<16x16xf32>
    %25 = vector.extract_strided_slice %15 {offsets = [0, 0], sizes = [16, 16], strides = [1, 1]} : vector<16x32xf32> to vector<16x16xf32>
    %26 = arith.mulf %24, %25 : vector<16x16xf32>
    %27 = arith.addf %23, %26 : vector<16x16xf32>
    %28 = vector.extract_strided_slice %13 {offsets = [0, 48], sizes = [16, 16], strides = [1, 1]} : vector<16x128xf32> to vector<16x16xf32>
    %29 = tpu.concatenate %27, %27 in 1 : vector<16x16xf32>, vector<16x16xf32> -> vector<16x32xf32>
    %30 = tpu.concatenate %28, %28 in 1 : vector<16x16xf32>, vector<16x16xf32> -> vector<16x32xf32>
    %31 = tpu.concatenate %20, %20, %20, %20 in 0 : vector<16x32xf32>, vector<16x32xf32>, vector<16x32xf32>, vector<16x32xf32> -> vector<64x32xf32>
    %c0_9 = arith.constant 0 : index
    %c0_10 = arith.constant 0 : index
    %32 = vector.load %arg5[%c0_9, %c0_10] : memref<64x48xf32, #tpu.memory_space<vmem>>, vector<64x32xf32>
    %33 = arith.mulf %31, %32 : vector<64x32xf32>
    %34 = arith.truncf %33 : vector<64x32xf32> to vector<64x32xbf16>
    %35 = arith.truncf %29 : vector<16x32xf32> to vector<16x32xbf16>
    %cst_11 = arith.constant dense<0.000000e+00> : vector<64x16xf32>
    %36 = tpu.matmul %34, %35, %cst_11 {dimension_numbers = #tpu.dot_dimension_numbers<[1], [1], [0], [0], [0, 0, 1, 0], [], []>} : vector<64x32xbf16>, vector<16x32xbf16>, vector<64x16xf32> -> vector<64x16xf32>
    %c0_12 = arith.constant 0 : index
    %c32_13 = arith.constant 32 : index
    %37 = vector.load %arg5[%c0_12, %c32_13] : memref<64x48xf32, #tpu.memory_space<vmem>>, vector<64x16xf32>
    %38 = arith.addf %36, %37 : vector<64x16xf32>
    %cst_14 = arith.constant dense<0xFF800000> : vector<64xf32>
    %39 = vector.multi_reduction <maximumf>, %38, %cst_14 [1] : vector<64x16xf32> to vector<64xf32>
    %40 = vector.shape_cast %39 : vector<64xf32> to vector<64x1xf32>
    %41 = vector.broadcast %40 : vector<64x1xf32> to vector<64x16xf32>
    %42 = arith.subf %38, %41 : vector<64x16xf32>
    %43 = math.exp %42 : vector<64x16xf32>
    %cst_15 = arith.constant dense<0.000000e+00> : vector<64xf32>
    %44 = vector.multi_reduction <add>, %43, %cst_15 [1] : vector<64x16xf32> to vector<64xf32>
    %45 = vector.shape_cast %44 : vector<64xf32> to vector<64x1xf32>
    %46 = tpu.reciprocal %45 {approx = true} : vector<64x1xf32> -> vector<64x1xf32>
    %47 = vector.broadcast %46 : vector<64x1xf32> to vector<64x16xf32>
    %48 = arith.mulf %43, %47 : vector<64x16xf32>
    %49 = arith.truncf %48 : vector<64x16xf32> to vector<64x16xbf16>
    %50 = arith.truncf %30 : vector<16x32xf32> to vector<16x32xbf16>
    %cst_16 = arith.constant dense<0.000000e+00> : vector<64x32xf32>
    %51 = tpu.matmul %49, %50, %cst_16 {dimension_numbers = #tpu.dot_dimension_numbers<[1], [0], [0], [1], [0, 0, 1, 1], [], []>} : vector<64x16xbf16>, vector<16x32xbf16>, vector<64x32xf32> -> vector<64x32xf32>
    %cst_17 = arith.constant 0.000000e+00 : f32
    %52 = vector.broadcast %cst_17 : f32 to vector<16x32xf32>
    %53 = vector.extract_strided_slice %51 {offsets = [0, 0], sizes = [16, 32], strides = [1, 1]} : vector<64x32xf32> to vector<16x32xf32>
    %c0_18 = arith.constant 0 : index
    %c0_19 = arith.constant 0 : index
    %54 = vector.load %arg5[%c0_18, %c0_19] : memref<64x48xf32, #tpu.memory_space<vmem>>, vector<16x32xf32>
    %55 = arith.mulf %53, %54 : vector<16x32xf32>
    %56 = arith.addf %52, %55 : vector<16x32xf32>
    %57 = vector.extract_strided_slice %51 {offsets = [16, 0], sizes = [16, 32], strides = [1, 1]} : vector<64x32xf32> to vector<16x32xf32>
    %c16 = arith.constant 16 : index
    %c0_20 = arith.constant 0 : index
    %58 = vector.load %arg5[%c16, %c0_20] : memref<64x48xf32, #tpu.memory_space<vmem>>, vector<16x32xf32>
    %59 = arith.mulf %57, %58 : vector<16x32xf32>
    %60 = arith.addf %56, %59 : vector<16x32xf32>
    %61 = vector.extract_strided_slice %51 {offsets = [32, 0], sizes = [16, 32], strides = [1, 1]} : vector<64x32xf32> to vector<16x32xf32>
    %c32_21 = arith.constant 32 : index
    %c0_22 = arith.constant 0 : index
    %62 = vector.load %arg5[%c32_21, %c0_22] : memref<64x48xf32, #tpu.memory_space<vmem>>, vector<16x32xf32>
    %63 = arith.mulf %61, %62 : vector<16x32xf32>
    %64 = arith.addf %60, %63 : vector<16x32xf32>
    %65 = vector.extract_strided_slice %51 {offsets = [48, 0], sizes = [16, 32], strides = [1, 1]} : vector<64x32xf32> to vector<16x32xf32>
    %c48 = arith.constant 48 : index
    %c0_23 = arith.constant 0 : index
    %66 = vector.load %arg5[%c48, %c0_23] : memref<64x48xf32, #tpu.memory_space<vmem>>, vector<16x32xf32>
    %67 = arith.mulf %65, %66 : vector<16x32xf32>
    %68 = arith.addf %64, %67 : vector<16x32xf32>
    %69 = arith.truncf %68 : vector<16x32xf32> to vector<16x32xbf16>
    %c0_24 = arith.constant 0 : index
    %c0_25 = arith.constant 0 : index
    %70 = vector.load %arg4[%c0_24, %c0_25] : memref<96x32xbf16, #tpu.memory_space<vmem>>, vector<32x32xbf16>
    %cst_26 = arith.constant dense<0.000000e+00> : vector<16x32xf32>
    %71 = tpu.matmul %69, %70, %cst_26 {dimension_numbers = #tpu.dot_dimension_numbers<[1], [0], [0], [1], [0, 0, 1, 1], [], []>} : vector<16x32xbf16>, vector<32x32xbf16>, vector<16x32xf32> -> vector<16x32xf32>
    %72 = arith.addf %0, %71 : vector<16x32xf32>
    %73 = arith.mulf %72, %72 : vector<16x32xf32>
    %cst_27 = arith.constant dense<0.000000e+00> : vector<16xf32>
    %74 = vector.multi_reduction <add>, %73, %cst_27 [1] : vector<16x32xf32> to vector<16xf32>
    %75 = vector.shape_cast %74 : vector<16xf32> to vector<16x1xf32>
    %cst_28 = arith.constant 3.200000e+01 : f32
    %76 = vector.broadcast %cst_28 : f32 to vector<16x1xf32>
    %77 = arith.divf %75, %76 : vector<16x1xf32>
    %cst_29 = arith.constant 9.99999974E-6 : f32
    %78 = vector.broadcast %cst_29 : f32 to vector<16x1xf32>
    %79 = arith.addf %77, %78 : vector<16x1xf32>
    %80 = math.rsqrt %79 : vector<16x1xf32>
    %81 = vector.broadcast %80 : vector<16x1xf32> to vector<16x32xf32>
    %82 = arith.mulf %72, %81 : vector<16x32xf32>
    %83 = arith.truncf %82 : vector<16x32xf32> to vector<16x32xbf16>
    %c0_30 = arith.constant 0 : index
    %c128 = arith.constant 128 : index
    %84 = vector.load %arg3[%c0_30, %c128] : memref<32x256xbf16, #tpu.memory_space<vmem>>, vector<32x128xbf16>
    %cst_31 = arith.constant dense<0.000000e+00> : vector<16x128xf32>
    %85 = tpu.matmul %83, %84, %cst_31 {dimension_numbers = #tpu.dot_dimension_numbers<[1], [0], [0], [1], [0, 0, 1, 1], [], []>} : vector<16x32xbf16>, vector<32x128xbf16>, vector<16x128xf32> -> vector<16x128xf32>
    %86 = vector.extract_strided_slice %85 {offsets = [0, 0], sizes = [16, 64], strides = [1, 1]} : vector<16x128xf32> to vector<16x64xf32>
    %87 = vector.extract_strided_slice %85 {offsets = [0, 64], sizes = [16, 64], strides = [1, 1]} : vector<16x128xf32> to vector<16x64xf32>
    %88 = arith.negf %86 : vector<16x64xf32>
    %89 = math.exp %88 : vector<16x64xf32>
    %cst_32 = arith.constant 1.000000e+00 : f32
    %90 = vector.broadcast %cst_32 : f32 to vector<16x64xf32>
    %91 = arith.addf %90, %89 : vector<16x64xf32>
    %92 = arith.divf %90, %91 : vector<16x64xf32>
    %93 = arith.mulf %86, %92 : vector<16x64xf32>
    %94 = arith.mulf %93, %87 : vector<16x64xf32>
    %95 = arith.truncf %94 : vector<16x64xf32> to vector<16x64xbf16>
    %c32_33 = arith.constant 32 : index
    %c0_34 = arith.constant 0 : index
    %96 = vector.load %arg4[%c32_33, %c0_34] : memref<96x32xbf16, #tpu.memory_space<vmem>>, vector<64x32xbf16>
    %cst_35 = arith.constant dense<0.000000e+00> : vector<16x32xf32>
    %97 = tpu.matmul %95, %96, %cst_35 {dimension_numbers = #tpu.dot_dimension_numbers<[1], [0], [0], [1], [0, 0, 1, 1], [], []>} : vector<16x64xbf16>, vector<64x32xbf16>, vector<16x32xf32> -> vector<16x32xf32>
    %98 = arith.addf %72, %97 : vector<16x32xf32>
    %c0_36 = arith.constant 0 : index
    %c0_37 = arith.constant 0 : index
    %99 = vector.load %arg6[%c0_36, %c0_37] : memref<16x32xf32, #tpu.memory_space<vmem>>, vector<16x32xf32>
    tpu.vector_store %arg6[%c0_36, %c0_37], %98 {strides = array<i32>} : memref<16x32xf32, #tpu.memory_space<vmem>>, vector<16x32xf32>,
    return
  }
  func.func @transform_0(%arg0: i32) -> (i32, i32) {
    %c0_i32 = arith.constant 0 : i32
    %c0_i32_0 = arith.constant 0 : i32
    %c0_i32_1 = arith.constant 0 : i32
    return %c0_i32, %c0_i32_0 : i32, i32
  }
  func.func @transform_1(%arg0: i32) -> (i32, i32) {
    %c0_i32 = arith.constant 0 : i32
    %c0_i32_0 = arith.constant 0 : i32
    %c0_i32_1 = arith.constant 0 : i32
    return %c0_i32, %c0_i32_0 : i32, i32
  }
  func.func @transform_2(%arg0: i32) -> (i32, i32) {
    %c0_i32 = arith.constant 0 : i32
    %c0_i32_0 = arith.constant 0 : i32
    %c0_i32_1 = arith.constant 0 : i32
    return %c0_i32, %c0_i32_0 : i32, i32
  }
  func.func @transform_3(%arg0: i32) -> (i32, i32) {
    %c0_i32 = arith.constant 0 : i32
    %c0_i32_0 = arith.constant 0 : i32
    %c0_i32_1 = arith.constant 0 : i32
    return %c0_i32, %c0_i32_0 : i32, i32
  }
  func.func @transform_4(%arg0: i32) -> (i32, i32) {
    %c0_i32 = arith.constant 0 : i32
    %c0_i32_0 = arith.constant 0 : i32
    %c0_i32_1 = arith.constant 0 : i32
    return %c0_i32, %c0_i32_0 : i32, i32
  }
  func.func @transform_5(%arg0: i32) -> (i32, i32) {
    %c0_i32 = arith.constant 0 : i32
    %c0_i32_0 = arith.constant 0 : i32
    %c0_i32_1 = arith.constant 0 : i32
    return %c0_i32, %c0_i32_0 : i32, i32
  }
}

</mosaic_0001>

<bundles_post_ra>
// kernel: neg.1
= control target key start
LH: loop header
LB: loop body
LE: loop exit
PB: predicated region body
PF: predicated region fallthrough
CT: control target
= control target key end

     0   :  { %s24_s0 = inlined_call_operand.vmem [shape: f32[8,4], index: 0, kind: input, shape index: {}]   ;;  %s25_s1 = inlined_call_operand.vmem [shape: f32[8,4], index: 1, kind: output, shape index: {}]  }
   0x1   :  { %v2_v0 = vld [vmem:[%s24_s0] sm:$0xf] }
   0x2   :  { %v5_v1 = vxor.u32 2147483648, %v2_v0 }
   0x4   :  { %7 = vst [vmem:[%s25_s1] sm:$0xf] %v5_v1 }

// kernel: tile.18
= control target key start
LH: loop header
LB: loop body
LE: loop exit
PB: predicated region body
PF: predicated region fallthrough
CT: control target
= control target key end

     0   :  { %s154_s0 = inlined_call_operand.vmem [shape: f32[8,8], index: 0, kind: input, shape index: {}]   ;;  %s155_s1 = inlined_call_operand.vmem [shape: f32[2,8,4,8], index: 1, kind: output, shape index: {}]  }
   0x1   :  { %v4_v0 = vld [vmem:[%s154_s0] ss:$0 sm:$0xff]  ;;  %v51_v1 = vld [vmem:[%s154_s0 + $0x1] ss:$0 sm:$0xff]  ;;  %v54_v2 = vld [vmem:[%s154_s0 + $0x2] ss:$0 sm:$0xff] }
   0x2   :  { %5 = vst [vmem:[%s155_s1] sm:$0xf] %v4_v0  ;;  %50 = vst [vmem:[%s155_s1 + $0x20] sm:$0xf] %v4_v0  ;;  %v57_v3 = vld [vmem:[%s154_s0 + $0x3] ss:$0 sm:$0xff] }
   0x3   :  { %52 = vst [vmem:[%s155_s1 + $0x4] sm:$0xf] %v51_v1  ;;  %53 = vst [vmem:[%s155_s1 + $0x24] sm:$0xf] %v51_v1  ;;  %v60_v4 = vld [vmem:[%s154_s0 + $0x4] ss:$0 sm:$0xff] }
   0x4   :  { %55 = vst [vmem:[%s155_s1 + $0x8] sm:$0xf] %v54_v2  ;;  %56 = vst [vmem:[%s155_s1 + $0x28] sm:$0xf] %v54_v2  ;;  %v63_v5 = vld [vmem:[%s154_s0 + $0x5] ss:$0 sm:$0xff] }
   0x5   :  { %58 = vst [vmem:[%s155_s1 + $0xc] sm:$0xf] %v57_v3  ;;  %59 = vst [vmem:[%s155_s1 + $0x2c] sm:$0xf] %v57_v3  ;;  %v66_v6 = vld [vmem:[%s154_s0 + $0x6] ss:$0 sm:$0xff] }
   0x6   :  { %61 = vst [vmem:[%s155_s1 + $0x10] sm:$0xf] %v60_v4  ;;  %62 = vst [vmem:[%s155_s1 + $0x30] sm:$0xf] %v60_v4  ;;  %v69_v7 = vld [vmem:[%s154_s0 + $0x7] ss:$0 sm:$0xff] }
   0x7   :  { %64 = vst [vmem:[%s155_s1 + $0x14] sm:$0xf] %v63_v5  ;;  %65 = vst [vmem:[%s155_s1 + $0x34] sm:$0xf] %v63_v5 }
   0x8   :  { %67 = vst [vmem:[%s155_s1 + $0x18] sm:$0xf] %v66_v6  ;;  %68 = vst [vmem:[%s155_s1 + $0x38] sm:$0xf] %v66_v6 }
   0x9   :  { %70 = vst [vmem:[%s155_s1 + $0x1c] sm:$0xf] %v69_v7  ;;  %71 = vst [vmem:[%s155_s1 + $0x3c] sm:$0xf] %v69_v7 }

// kernel: tile.19
= control target key start
LH: loop header
LB: loop body
LE: loop exit
PB: predicated region body
PF: predicated region fallthrough
CT: control target
= control target key end

     0   :  { %vm82_vm0 = vcmask 1047556   ;;  %vm84_vm1 = vcmask 64512   ;;  %s195_s9 = smov 24   ;;  %s196_s14 = smov 8   ;;  %vm103_vm2 = vcmask 261312   ;;  %vm124_vm3 = vcmask 195712   ;;  %s289_s0 = inlined_call_operand.vmem [shape: f32[2,8,4,8], index: 0, kind: input, shape index: {}]   ;;  %s290_s1 = inlined_call_operand.vmem [shape: f32[16,32], index: 1, kind: output, shape index: {}]  }
   0x1   :  { %v180_v0 = vld [vmem:[%s289_s0 + $0x1c] sm:$0xf]  ;;  %v181_v1 = vld [vmem:[%s289_s0 + $0x18] sm:$0xf]  ;;  %v182_v2 = vld [vmem:[%s289_s0 + $0x14] sm:$0xf] }
   0x2   :  { %48 = vst [vmem:[#allocation0 + $0x38] sm:$0xf] %v180_v0  ;;  %53 = vst [vmem:[#allocation0 + $0x30] sm:$0xf] %v181_v1  ;;  %v183_v3 = vld [vmem:[%s289_s0 + $0x10] sm:$0xf] }
   0x3   :  { %58 = vst [vmem:[#allocation0 + $0x28] sm:$0xf] %v182_v2  ;;  %v184_v4 = vld [vmem:[%s289_s0 + $0xc] sm:$0xf]  ;;  %v185_v5 = vld [vmem:[%s289_s0 + $0x8] sm:$0xf] }
   0x4   :  { %63 = vst [vmem:[#allocation0 + $0x20] sm:$0xf] %v183_v3  ;;  %68 = vst [vmem:[#allocation0 + $0x18] sm:$0xf] %v184_v4  ;;  %v186_v6 = vld [vmem:[%s289_s0 + $0x4] sm:$0xf] }
   0x5   :  { %73 = vst [vmem:[#allocation0 + $0x10] sm:$0xf] %v185_v5  ;;  %v78_v7 = vld [vmem:[%s289_s0] sm:$0xf]  ;;  %77 = vst [vmem:[#allocation0 + $0x8] sm:$0xf] %v186_v6 }
   0x6   :  { %79 = vst [vmem:[#allocation0] sm:$0xf] %v78_v7  ;;  %v172_v8 = vld [vmem:[%s289_s0 + $0x3c] sm:$0xf]  ;;  %v173_v9 = vld [vmem:[%s289_s0 + $0x38] sm:$0xf] }
   0x7   :  { %8 = vst [vmem:[#allocation0 + $0x78] sm:$0xf] %v172_v8  ;;  %13 = vst [vmem:[#allocation0 + $0x70] sm:$0xf] %v173_v9  ;;  %v174_v10 = vld [vmem:[%s289_s0 + $0x34] sm:$0xf] }
   0x8   :  { %v175_v11 = vld [vmem:[%s289_s0 + $0x30] sm:$0xf]  ;;  %v176_v12 = vld [vmem:[%s289_s0 + $0x2c] sm:$0xf]  ;;  %18 = vst [vmem:[#allocation0 + $0x68] sm:$0xf] %v174_v10 }
   0x9   :  { %23 = vst [vmem:[#allocation0 + $0x60] sm:$0xf] %v175_v11  ;;  %28 = vst [vmem:[#allocation0 + $0x58] sm:$0xf] %v176_v12  ;;  %v177_v13 = vld [vmem:[%s289_s0 + $0x28] sm:$0xf] }
   0xa   :  { %v178_v14 = vld [vmem:[%s289_s0 + $0x24] sm:$0xf]  ;;  %v179_v15 = vld [vmem:[%s289_s0 + $0x20] sm:$0xf]  ;;  %33 = vst [vmem:[#allocation0 + $0x50] sm:$0xf] %v177_v13 }
   0xb   :  { %38 = vst [vmem:[#allocation0 + $0x48] sm:$0xf] %v178_v14  ;;  %43 = vst [vmem:[#allocation0 + $0x40] sm:$0xf] %v179_v15  ;;  %s194_s0 = smov 16   ;;  %vm145_vm4 = vcmask 130112  }
   0xc   :  { %v119_v16 = vld [vmem:[#allocation0 + $0x2] ss:$8 sm:$0xf0]   ;;  %v98_v17 = vld [vmem:[#allocation0 + $0x3] ss:$8 sm:$0xf0]  }
   0xd   :  { %v117_v18 = vld [vmem:[#allocation0 + $0x2] ss:$8 sm:$0xf]   ;;  %v96_v19 = vld [vmem:[#allocation0 + $0x3] ss:$8 sm:$0xf]  }
   0xe   :  { %v121_v20 = vsel %vm82_vm0, %v119_v16, %v117_v18  ;;  %v100_v21 = vsel %vm82_vm0, %v98_v17, %v96_v19  ;;  %v138_v24 = vld [vmem:[#allocation0 + $0x1] ss:$8 sm:$0xf]   ;;  %v80_v32 = vld [vmem:[#allocation0] ss:$8 sm:$0xf]  }
   0xf   :  { %122 = vrot.lane.b32.xlu1 %v121_v20, %s194_s0  ;;  %101 = vrot.lane.b32.xlu0 %v100_v21, %s195_s9  ;;  %v140_v25 = vld [vmem:[#allocation0 + $0x1] ss:$8 sm:$0xf0]   ;;  %v81_v33 = vld [vmem:[#allocation0] ss:$8 sm:$0xf0]  }
  0x10   :  { %v129_v22 = vld [vmem:[#allocation0 + $0x42] ss:$8 sm:$0xf0]   ;;  %v108_v23 = vld [vmem:[#allocation0 + $0x43] ss:$8 sm:$0xf0]   ;;  %v83_v34 = vsel %vm82_vm0, %v81_v33, %v80_v32  ;;  %v142_v38 = vsel %vm82_vm0, %v140_v25, %v138_v24 }
  0x11   :  { %v150_v31 = vld [vmem:[#allocation0 + $0x41] ss:$8 sm:$0xf0]   ;;  %v89_v36 = vld [vmem:[#allocation0 + $0x40] ss:$8 sm:$0xf0]  }
  0x12   :  { %v127_v26 = vld [vmem:[#allocation0 + $0x42] ss:$8 sm:$0xf]   ;;  %v106_v27 = vld [vmem:[#allocation0 + $0x43] ss:$8 sm:$0xf]  }
  0x13   :  { %v131_v28 = vsel %vm82_vm0, %v129_v22, %v127_v26  ;;  %v110_v29 = vsel %vm82_vm0, %v108_v23, %v106_v27  ;;  %v148_v30 = vld [vmem:[#allocation0 + $0x41] ss:$8 sm:$0xf]   ;;  %v87_v35 = vld [vmem:[#allocation0 + $0x40] ss:$8 sm:$0xf]  }
  0x14   :  { %132 = vrot.lane.b32.xlu1 %v131_v28, %s194_s0  ;;  %111 = vrot.lane.b32.xlu0 %v110_v29, %s195_s9  ;;  %v152_v37 = vsel %vm82_vm0, %v150_v31, %v148_v30  ;;  %85 = vst.msk [vmem:[%s290_s1] sm:$0xff] %vm84_vm1, %v83_v34   ;;  %v91_v39 = vsel %vm82_vm0, %v89_v36, %v87_v35 }
  0x15   :  { %187 = vst.msk [vmem:[%s290_s1 + $0x8] sm:$0xff] %vm84_vm1, %v91_v39  }
  0x18   :  { %153 = vrot.lane.b32.xlu1 %v152_v37, %s196_s14  ;;  %143 = vrot.lane.b32.xlu0 %v142_v38, %s196_s14 }
  0x81   :  { %v123_v40 = vpop.permute.xlu1 %122   ;;  %v102_v41 = vpop.permute.xlu0 %101  }
  0x82   :  { %104 = vst.msk [vmem:[%s290_s1] sm:$0xff] %vm103_vm2, %v102_v41  }
  0x83   :  { %125 = vst.msk [vmem:[%s290_s1] sm:$0xff] %vm124_vm3, %v123_v40  }
  0x86   :  { %v133_v42 = vpop.permute.xlu1 %132   ;;  %v112_v43 = vpop.permute.xlu0 %111  }
  0x87   :  { %188 = vst.msk [vmem:[%s290_s1 + $0x8] sm:$0xff] %vm103_vm2, %v112_v43  }
  0x88   :  { %189 = vst.msk [vmem:[%s290_s1 + $0x8] sm:$0xff] %vm124_vm3, %v133_v42  }
  0x8a   :  { %v154_v44 = vpop.permute.xlu1 %153   ;;  %v144_v45 = vpop.permute.xlu0 %143  }
  0x8b   :  { %190 = vst.msk [vmem:[%s290_s1 + $0x8] sm:$0xff] %vm145_vm4, %v154_v44   ;;  %146 = vst.msk [vmem:[%s290_s1] sm:$0xff] %vm145_vm4, %v144_v45  }

// kernel: decoder_layer.1
= control target key start
LH: loop header
LB: loop body
LE: loop exit
PB: predicated region body
PF: predicated region fallthrough
CT: control target
= control target key end

     0   :  { %vm26_vm0 = vcmask 261120   ;;  %s1256_s0 = inlined_call_operand.vmem [shape: f32[16,32], index: 0, kind: input, shape index: {}]   ;;  %s1257_s1 = inlined_call_operand.vmem [shape: f32[16,64], index: 1, kind: input, shape index: {}]   ;;  %s1258_s2 = inlined_call_operand.vmem [shape: bf16[32,256], index: 2, kind: input, shape index: {}]   ;;  %s1259_s3 = inlined_call_operand.vmem [shape: bf16[96,32], index: 3, kind: input, shape index: {}]   ;;  %s1260_s4 = inlined_call_operand.vmem [shape: f32[64,48], index: 4, kind: input, shape index: {}]   ;;  %s1261_s5 = inlined_call_operand.hbm [shape: f32[16,32], index: 5, kind: output, shape index: {}]  }
   0x1   :  { %v1025_v0 = vld [vmem:[%s1256_s0] sm:$0xff]  ;;  %v1030_v1 = vld [vmem:[%s1256_s0 + $0x8] sm:$0xff] }
   0x2   :  { %v24_v2 = vmul.f32 %v1025_v0, %v1025_v0  ;;  %v25_v3 = vmul.f32 %v1030_v1, %v1030_v1 }
   0x4   :  { %v27_v4 = vsel %vm26_vm0, %v24_v2, 0.0  ;;  %v30_v5 = vsel %vm26_vm0, %v25_v3, 0.0 }
   0x5   :  { %28 = vadd.xlane.f32.xlu0 %v27_v4 }
   0x6   :  { %10 = vsyncpa [#allocation3], 0  ;;  %v900_v6 = vld [vmem:[%s1258_s2] ss:$8 sps:$4 sm:$0xff]   ;;  %v982_v7 = vmov 0.0   ;;  %vm983_vm1 = vmmov 0  }
   0x7   :  { %813 = vmatprep.subr.bf16.mxu0 %v982_v7  ;;  %817 = vmatprep.mubr.msk.bf16.mxu0 %vm983_vm1, %v982_v7  ;;  %v901_v8 = vld [vmem:[%s1258_s2 + $0x10] ss:$8 sps:$4 sm:$0xff]   ;;  %v1051_v9 = vld [vmem:[%s1257_s1] sm:$0xff]  ;;  %s984_s27 = smov 64   ;;  %s985_s28 = smov 32   ;;  %v104_v10 = vld [vmem:[%s1257_s1 + $0x8] sm:$0xff] }
   0x8   :  { %814 = vmatpush3.bf16.msra.mxu0 %v900_v6  ;;  %127 = vrot.lane.b32.xlu1 %v1051_v9, %s984_s27  ;;  %v1071_v33 = vld [vmem:[%s1260_s4 + $0x8] sm:$0xff]  ;;  %s986_s7 = smov 96   ;;  %v1078_v34 = vld [vmem:[%s1260_s4 + $0x18] sm:$0xff]  ;;  %s987_s14 = smov 112   ;;  %v1101_v44 = vld [vmem:[%s1260_s4] sm:$0xff]  ;;  %vm159_vm2 = vcmask 130048  }
   0x9   :  { %31 = vadd.xlane.f32.xlu0 %v30_v5  ;;  %815 = vmatprep.subr.bf16.mxu0 %v982_v7  ;;  %v1085_v35 = vld [vmem:[%s1260_s4 + $0x28] sm:$0xff]  ;;  %v1092_v36 = vld [vmem:[%s1260_s4 + $0x38] sm:$0xff]  ;;  %v1108_v45 = vld [vmem:[%s1260_s4 + $0x10] sm:$0xff]  ;;  %vm700_vm3 = vcmask 523264  }
   0xa   :  { %v1115_v46 = vld [vmem:[%s1260_s4 + $0x20] sm:$0xff]  ;;  %v1122_v47 = vld [vmem:[%s1260_s4 + $0x30] sm:$0xff]  ;;  %s988_s4 = smov 80  }
   0xc   :  { %816 = vmatpush3.bf16.msra.mxu0 %v901_v8  ;;  %129 = vrot.lane.b32.xlu1 %v104_v10, %s984_s27 }
  0x10   :  { %111 = vrot.lane.b32.xlu1 %v104_v10, %s985_s28 }
  0x1f   :  { %109 = vrot.lane.b32.xlu0 %v1051_v9, %s985_s28 }
  0x7a   :  { %v128_v22 = vpop.permute.xlu1 %127 }
  0x7e   :  { %v130_v23 = vpop.permute.xlu1 %129 }
  0x82   :  { %v112_v25 = vpop.permute.xlu1 %111 }
  0x92   :  { %v29_v11 = vpop.xlane.xlu0 %28 }
  0x93   :  { %v34_v12 = vmul.f32 0.03125, %v29_v11 }
  0x95   :  { %v36_v13 = vadd.f32 1e-05, %v34_v12 }
  0x96   :  { %v32_v14 = vpop.xlane.xlu0 %31 }
  0x97   :  { %v35_v15 = vmul.f32 0.03125, %v32_v14  ;;  %910 = vrsqrt.f32 %v36_v13 }
  0x99   :  { %v37_v16 = vadd.f32 1e-05, %v35_v15 }
  0x9a   :  { %v110_v37 = vpop.permute.xlu0 %109 }
  0x9b   :  { %912 = vrsqrt.f32 %v37_v16 }
  0xa1   :  { %v911_v17 = vpop.eup %910 }
  0xa2   :  { %v40_v19 = vmul.f32 %v911_v17, %v1025_v0 }
  0xa5   :  { %v913_v18 = vpop.eup %912 }
  0xa6   :  { %v41_v20 = vmul.f32 %v913_v18, %v1030_v1 }
  0xa8   :  { %v42_v21 = vpack.c.bf16 %v41_v20, %v40_v19 }
  0xaa   :  { %818 = vmatmul.mubr.msk.bf16.vlgmr.msra.gmra.mrb[0].mxu0 %vm26_vm0, %v42_v21 }
 0x17d   :  { %v96_v24 = vpop.f32.mrb[0].mxu0 }
 0x17e   :  { %v819_v26 = vpop.f32.mrb[1].mxu0  ;;  %v133_v27 = vmul.f32 %v128_v22, %v96_v24  ;;  %v115_v39 = vmul.f32 %v110_v37, %v96_v24  ;;  %v105_v57 = vmul.f32 %v1051_v9, %v96_v24 }
 0x17f   :  { %v99_v28 = vpop.f32.mrb[2].mxu0 }
 0x180   :  { %137 = vrot.lane.b32.xlu1 %v133_v27, %s984_s27  ;;  %v820_v29 = vpop.f32.mrb[3].mxu0  ;;  %v116_v30 = vmul.f32 %v112_v25, %v99_v28  ;;  %v1064_v31 = vpack.i.bf16 %v99_v28, %v96_v24  ;;  %v134_v32 = vmul.f32 %v130_v23, %v99_v28  ;;  %v106_v50 = vmul.f32 %v104_v10, %v99_v28 }
 0x182   :  { %121 = vrot.lane.b32.xlu0 %v116_v30, %s984_s27 }
 0x184   :  { %139 = vrot.lane.b32.xlu1 %v134_v32, %s984_s27 }
 0x186   :  { %209 = vrot.lane.b32.xlu0 %v1071_v33, %s986_s7 }
 0x18a   :  { %213 = vrot.lane.b32.xlu0 %v1078_v34, %s986_s7 }
 0x18e   :  { %217 = vrot.lane.b32.xlu0 %v1085_v35, %s986_s7 }
 0x192   :  { %221 = vrot.lane.b32.xlu0 %v1092_v36, %s986_s7 }
 0x1f2   :  { %v138_v38 = vpop.permute.xlu1 %137 }
 0x1f3   :  { %v143_v41 = vadd.f32 %v138_v38, %v115_v39 }
 0x1f4   :  { %v122_v49 = vpop.permute.xlu0 %121 }
 0x1f5   :  { %v126_v51 = vadd.f32 %v122_v49, %v106_v50 }
 0x1f6   :  { %v140_v40 = vpop.permute.xlu1 %139 }
 0x1f7   :  { %v144_v42 = vadd.f32 %v140_v40, %v116_v30  ;;  %v189_v62 = vmul.f32 %v1078_v34, %v126_v51  ;;  %v191_v2 = vmul.f32 %v1085_v35, %v126_v51  ;;  %v193_v3 = vmul.f32 %v1092_v36, %v126_v51 }
 0x1f8   :  { %v187_v5 = vmul.f32 %v1071_v33, %v126_v51  ;;  %v210_v16 = vpop.permute.xlu0 %209 }
 0x1f9   :  { %v880_v43 = vpack.i.bf16 %v144_v42, %v143_v41 }
 0x1fb   :  { %881 = vrot.lane.b32.xlu1 %v880_v43, %s986_s7 }
 0x1fc   :  { %v214_v18 = vpop.permute.xlu0 %213 }
 0x1ff   :  { %886 = vrot.lane.b32.xlu1 %v880_v43, %s987_s14 }
 0x200   :  { %v218_v28 = vpop.permute.xlu0 %217 }
 0x203   :  { %119 = vrot.lane.b32.xlu1 %v115_v39, %s984_s27 }
 0x204   :  { %v222_v43 = vpop.permute.xlu0 %221 }
 0x207   :  { %207 = vrot.lane.b32.xlu1 %v1101_v44, %s986_s7 }
 0x20b   :  { %211 = vrot.lane.b32.xlu1 %v1108_v45, %s986_s7 }
 0x20f   :  { %215 = vrot.lane.b32.xlu1 %v1115_v46, %s986_s7 }
 0x213   :  { %219 = vrot.lane.b32.xlu1 %v1122_v47, %s986_s7 }
 0x26d   :  { %v882_v48 = vpop.permute.xlu1 %881 }
 0x26e   :  { %v884_v53 = vunpack.i.h.bf16 %v882_v48  ;;  %v883_v54 = vunpack.i.l.bf16 %v882_v48 }
 0x271   :  { %v887_v52 = vpop.permute.xlu1 %886 }
 0x272   :  { %v889_v55 = vunpack.i.h.bf16 %v887_v52  ;;  %v888_v56 = vunpack.i.l.bf16 %v887_v52 }
 0x274   :  { %v160_v58 = vsel %vm159_vm2, %v883_v54, %v888_v56  ;;  %v161_v59 = vsel %vm159_vm2, %v884_v53, %v889_v55 }
 0x275   :  { %v120_v60 = vpop.permute.xlu1 %119  ;;  %v198_v61 = vpack.c.bf16 %v161_v59, %v160_v58 }
 0x276   :  { %v125_v63 = vadd.f32 %v120_v60, %v105_v57 }
 0x277   :  { %869 = vmatprep.subr.msk.bf16.mxu1 %vm26_vm0, %v198_v61  ;;  %v244_v4 = vsel %vm26_vm0, %v198_v61, 0 }
 0x278   :  { %v188_v6 = vmul.f32 %v1108_v45, %v125_v63  ;;  %v190_v8 = vmul.f32 %v1115_v46, %v125_v63  ;;  %v192_v9 = vmul.f32 %v1122_v47, %v125_v63  ;;  %822 = vmatpush3.bf16.xpose.msra.mxu1 %v244_v4  ;;  %v186_v10 = vmul.f32 %v1101_v44, %v125_v63 }
 0x279   :  { %841 = vmatprep.subr.bf16.mxu1 %v982_v7  ;;  %v208_v15 = vpop.permute.xlu1 %207 }
 0x27a   :  { %v194_v11 = vpack.c.bf16 %v187_v5, %v186_v10  ;;  %v195_v12 = vpack.c.bf16 %v189_v62, %v188_v6  ;;  %v196_v13 = vpack.c.bf16 %v191_v2, %v190_v8  ;;  %v197_v14 = vpack.c.bf16 %v193_v3, %v192_v9 }
 0x27c   :  { %823 = vmatprep.mubr.msk.bf16.mxu1 %vm26_vm0, %v194_v11 }
 0x27d   :  { %v212_v17 = vpop.permute.xlu1 %211 }
 0x27f   :  { %824 = vmatmul.mubr.msk.bf16.vlgmr.msra.gmra.mrb[0].mxu1 %vm26_vm0, %v195_v12 }
 0x280   :  { %827 = vmatprep.mubr.msk.bf16.mxu1 %vm26_vm0, %v196_v13 }
 0x281   :  { %v216_v26 = vpop.permute.xlu1 %215 }
 0x285   :  { %v220_v39 = vpop.permute.xlu1 %219 }
 0x287   :  { %828 = vmatmul.mubr.msk.bf16.gmra.mrb[4].mxu1 %vm26_vm0, %v197_v14 }
 0x288   :  { %845 = vmatprep.mubr.msk.bf16.mxu1 %vm983_vm1, %v982_v7 }
 0x352   :  { %v825_v19 = vpop.f32.mrb[0].mxu1 }
 0x353   :  { %v280_v20 = vpop.f32.mrb[1].mxu1  ;;  %v289_v29 = vadd.f32 %v825_v19, %v212_v17 }
 0x354   :  { %v281_v21 = vadd.f32 %v280_v20, %v208_v15  ;;  %v826_v22 = vpop.f32.mrb[2].mxu1 }
 0x355   :  { %v283_v23 = vpop.f32.mrb[3].mxu1  ;;  %v292_v24 = vadd.f32 %v826_v22, %v214_v18  ;;  %v317_v42 = vsel %vm159_vm2, %v289_v29, -inf }
 0x356   :  { %v284_v25 = vadd.f32 %v283_v23, %v210_v16  ;;  %v311_v27 = vsel %vm159_vm2, %v281_v21, -inf }
 0x357   :  { %312 = vmax.xlane.f32.xlu1 %v311_v27  ;;  %v320_v37 = vsel %vm159_vm2, %v292_v24, -inf }
 0x358   :  { %v314_v30 = vsel %vm159_vm2, %v284_v25, -inf }
 0x359   :  { %315 = vmax.xlane.f32.xlu0 %v314_v30 }
 0x35a   :  { %v829_v32 = vpop.f32.mrb[4].mxu1 }
 0x35b   :  { %v296_v38 = vpop.f32.mrb[5].mxu1  ;;  %321 = vmax.xlane.f32.xlu1 %v320_v37  ;;  %v305_v50 = vadd.f32 %v829_v32, %v220_v39 }
 0x35c   :  { %v297_v40 = vadd.f32 %v296_v38, %v216_v26  ;;  %v830_v41 = vpop.f32.mrb[6].mxu1 }
 0x35d   :  { %v299_v48 = vpop.f32.mrb[7].mxu1  ;;  %318 = vmax.xlane.f32.xlu0 %v317_v42  ;;  %v308_v51 = vadd.f32 %v830_v41, %v222_v43  ;;  %v329_v54 = vsel %vm159_vm2, %v305_v50, -inf }
 0x35e   :  { %v300_v49 = vadd.f32 %v299_v48, %v218_v28  ;;  %v323_v52 = vsel %vm159_vm2, %v297_v40, -inf }
 0x35f   :  { %v332_v55 = vsel %vm159_vm2, %v308_v51, -inf }
 0x360   :  { %v326_v53 = vsel %vm159_vm2, %v300_v49, -inf }
 0x361   :  { %324 = vmax.xlane.f32.xlu0 %v323_v52  ;;  %327 = vmax.xlane.f32.xlu1 %v326_v53 }
 0x365   :  { %330 = vmax.xlane.f32.xlu0 %v329_v54  ;;  %333 = vmax.xlane.f32.xlu1 %v332_v55 }
 0x3e4   :  { %v313_v56 = vpop.xlane.xlu1 %312 }
 0x3e5   :  { %v335_v60 = vsub.f32 %v281_v21, %v313_v56 }
 0x3e6   :  { %v316_v57 = vpop.xlane.xlu0 %315 }
 0x3e7   :  { %v336_v58 = vsub.f32 %v284_v25, %v316_v57  ;;  %v343_v4 = vmul.f32 1.442695, %v335_v60 }
 0x3e8   :  { %v322_v59 = vpop.xlane.xlu1 %321 }
 0x3e9   :  { %v338_v61 = vsub.f32 %v292_v24, %v322_v59  ;;  %v345_v62 = vmul.f32 1.442695, %v336_v58 }
 0x3ea   :  { %v319_v63 = vpop.xlane.xlu0 %318 }
 0x3eb   :  { %v349_v2 = vmul.f32 1.442695, %v338_v61  ;;  %v337_v3 = vsub.f32 %v289_v29, %v319_v63 }
 0x3ed   :  { %914 = vpow2.f32 %v349_v2  ;;  %v347_v5 = vmul.f32 1.442695, %v337_v3 }
 0x3ee   :  { %916 = vpow2.f32 %v345_v62  ;;  %v328_v6 = vpop.xlane.xlu1 %327  ;;  %v325_v8 = vpop.xlane.xlu0 %324 }
 0x3ef   :  { %918 = vpow2.f32 %v347_v5  ;;  %v340_v9 = vsub.f32 %v300_v49, %v328_v6  ;;  %v339_v10 = vsub.f32 %v297_v40, %v325_v8 }
 0x3f0   :  { %920 = vpow2.f32 %v343_v4 }
 0x3f1   :  { %v353_v15 = vmul.f32 1.442695, %v340_v9  ;;  %v351_v18 = vmul.f32 1.442695, %v339_v10 }
 0x3f2   :  { %v334_v11 = vpop.xlane.xlu1 %333  ;;  %v331_v12 = vpop.xlane.xlu0 %330 }
 0x3f3   :  { %v342_v13 = vsub.f32 %v308_v51, %v334_v11  ;;  %v341_v14 = vsub.f32 %v305_v50, %v331_v12 }
 0x3f5   :  { %v357_v16 = vmul.f32 1.442695, %v342_v13  ;;  %v355_v17 = vmul.f32 1.442695, %v341_v14 }
 0x3f7   :  { %v1154_v19 = vpop.eup %914  ;;  %922 = vpow2.f32 %v357_v16 }
 0x3f8   :  { %v917_v20 = vpop.eup %916  ;;  %924 = vpow2.f32 %v355_v17  ;;  %v368_v21 = vsel %vm159_vm2, %v1154_v19, 0.0 }
 0x3f9   :  { %v919_v22 = vpop.eup %918  ;;  %926 = vpow2.f32 %v353_v15  ;;  %369 = vadd.xlane.f32.xlu1 %v368_v21  ;;  %v362_v25 = vsel %vm159_vm2, %v917_v20, 0.0 }
 0x3fa   :  { %928 = vpow2.f32 %v351_v18  ;;  %v365_v23 = vsel %vm159_vm2, %v919_v22, 0.0  ;;  %v921_v24 = vpop.eup %920 }
 0x3fb   :  { %366 = vadd.xlane.f32.xlu0 %v365_v23  ;;  %v359_v26 = vsel %vm159_vm2, %v921_v24, 0.0 }
 0x3fd   :  { %363 = vadd.xlane.f32.xlu1 %v362_v25 }
 0x3ff   :  { %360 = vadd.xlane.f32.xlu0 %v359_v26 }
 0x401   :  { %v1161_v27 = vpop.eup %922 }
 0x402   :  { %v925_v28 = vpop.eup %924  ;;  %v380_v29 = vsel %vm159_vm2, %v1161_v27, 0.0 }
 0x403   :  { %v927_v30 = vpop.eup %926  ;;  %381 = vadd.xlane.f32.xlu1 %v380_v29  ;;  %v377_v32 = vsel %vm159_vm2, %v925_v28, 0.0 }
 0x404   :  { %v929_v37 = vpop.eup %928  ;;  %378 = vadd.xlane.f32.xlu0 %v377_v32  ;;  %v374_v38 = vsel %vm159_vm2, %v927_v30, 0.0 }
 0x405   :  { %v371_v39 = vsel %vm159_vm2, %v929_v37, 0.0 }
 0x407   :  { %375 = vadd.xlane.f32.xlu1 %v374_v38 }
 0x408   :  { %372 = vadd.xlane.f32.xlu0 %v371_v39 }
 0x418   :  { %896 = vrot.lane.b32.xlu1 %v1064_v31, %s986_s7 }
 0x41e   :  { %891 = vrot.lane.b32.xlu0 %v1064_v31, %s988_s4 }
 0x486   :  { %v370_v40 = vpop.xlane.xlu1 %369 }
 0x488   :  { %v367_v41 = vpop.xlane.xlu0 %366 }
 0x48a   :  { %v364_v42 = vpop.xlane.xlu1 %363 }
 0x48b   :  { %930 = vrcp.f32 %v364_v42 }
 0x48c   :  { %v361_v43 = vpop.xlane.xlu0 %360 }
 0x48d   :  { %932 = vrcp.f32 %v361_v43 }
 0x48e   :  { %934 = vrcp.f32 %v367_v41 }
 0x48f   :  { %936 = vrcp.f32 %v370_v40 }
 0x490   :  { %v382_v48 = vpop.xlane.xlu1 %381 }
 0x491   :  { %v379_v49 = vpop.xlane.xlu0 %378 }
 0x494   :  { %v376_v50 = vpop.xlane.xlu1 %375 }
 0x495   :  { %v931_v51 = vpop.eup %930  ;;  %938 = vrcp.f32 %v376_v50  ;;  %v373_v52 = vpop.xlane.xlu0 %372 }
 0x496   :  { %940 = vrcp.f32 %v373_v52  ;;  %v392_v55 = vmul.f32 %v931_v51, %v917_v20  ;;  %v903_v20 = vld [vmem:[%s1259_s3 + $0x8] sm:$0xff]  }
 0x497   :  { %v933_v53 = vpop.eup %932  ;;  %942 = vrcp.f32 %v382_v48 }
 0x498   :  { %944 = vrcp.f32 %v379_v49  ;;  %v897_v54 = vpop.permute.xlu1 %896  ;;  %v391_v31 = vmul.f32 %v933_v53, %v921_v24  ;;  %v935_v59 = vpop.eup %934 }
 0x499   :  { %v899_v56 = vunpack.i.h.bf16 %v897_v54  ;;  %v898_v57 = vunpack.i.l.bf16 %v897_v54  ;;  %v892_v58 = vpop.permute.xlu0 %891  ;;  %v937_v63 = vpop.eup %936  ;;  %v393_v4 = vmul.f32 %v935_v59, %v919_v22 }
 0x49a   :  { %v894_v60 = vunpack.i.h.bf16 %v892_v58  ;;  %v893_v61 = vunpack.i.l.bf16 %v892_v58  ;;  %v399_v62 = vpack.c.bf16 %v392_v55, %v391_v31  ;;  %v394_v8 = vmul.f32 %v937_v63, %v1154_v19  ;;  %v902_v19 = vld [vmem:[%s1259_s3] sm:$0xff]  }
 0x49b   :  { %842 = vmatpush3.bf16.msra.mxu1 %v902_v19 }
 0x49c   :  { %833 = vmatprep.mubr.msk.bf16.mxu0 %vm159_vm2, %v399_v62  ;;  %v176_v2 = vsel %vm159_vm2, %v893_v61, %v898_v57  ;;  %v177_v3 = vsel %vm159_vm2, %v894_v60, %v899_v56  ;;  %v400_v12 = vpack.c.bf16 %v394_v8, %v393_v4  ;;  %843 = vmatprep.subr.bf16.mxu1 %v982_v7  ;;  %v907_v4 = vld [vmem:[%s1259_s3 + $0x18] sm:$0xff]  }
 0x49d   :  { %v403_v5 = vpack.c.bf16 %v177_v3, %v176_v2  ;;  %v906_v3 = vld [vmem:[%s1259_s3 + $0x10] sm:$0xff]  }
 0x49f   :  { %v939_v6 = vpop.eup %938  ;;  %831 = vmatprep.subr.bf16.mxu0 %v403_v5  ;;  %844 = vmatpush3.bf16.msra.mxu1 %v903_v20 }
 0x4a0   :  { %v941_v9 = vpop.eup %940  ;;  %832 = vmatpush3.bf16.msra.mxu0 %v403_v5  ;;  %v396_v10 = vmul.f32 %v939_v6, %v927_v30  ;;  %857 = vmatprep.subr.bf16.mxu1 %v982_v7  ;;  %v908_v5 = vld [vmem:[%s1259_s3 + $0x20] sm:$0xff]   ;;  %v909_v6 = vld [vmem:[%s1259_s3 + $0x28] sm:$0xff]   ;;  %s989_s3 = smov [#allocation2]  }
 0x4a1   :  { %v943_v11 = vpop.eup %942  ;;  %v395_v13 = vmul.f32 %v941_v9, %v929_v37  ;;  %849 = vmatprep.subr.bf16.mxu0 %v982_v7 }
 0x4a2   :  { %v945_v14 = vpop.eup %944  ;;  %v398_v17 = vmul.f32 %v943_v11, %v1161_v27 }
 0x4a3   :  { %834 = vmatmul.mubr.msk.bf16.vlgmr.msra.gmra.mrb[4].mxu0 %vm159_vm2, %v400_v12  ;;  %v401_v15 = vpack.c.bf16 %v396_v10, %v395_v13  ;;  %v397_v16 = vmul.f32 %v945_v14, %v925_v28 }
 0x4a5   :  { %837 = vmatprep.mubr.msk.bf16.mxu0 %vm159_vm2, %v401_v15  ;;  %v402_v18 = vpack.c.bf16 %v398_v17, %v397_v16 }
 0x4ab   :  { %838 = vmatmul.mubr.msk.bf16.gmra.mrb[8].mxu0 %vm159_vm2, %v402_v18 }
 0x4ac   :  { %853 = vmatprep.mubr.msk.bf16.mxu0 %vm983_vm1, %v982_v7 }
 0x576   :  { %v835_v21 = vpop.f32.mrb[4].mxu0 }
 0x577   :  { %v489_v22 = vmul.f32 %v835_v21, %v1108_v45  ;;  %v450_v23 = vpop.f32.mrb[5].mxu0 }
 0x578   :  { %v483_v24 = vmul.f32 %v450_v23, %v1101_v44  ;;  %v836_v25 = vpop.f32.mrb[6].mxu0 }
 0x579   :  { %v490_v26 = vmul.f32 %v836_v25, %v1078_v34  ;;  %v453_v27 = vpop.f32.mrb[7].mxu0 }
 0x57a   :  { %v491_v28 = vadd.f32 %v489_v22, %v483_v24  ;;  %v484_v29 = vmul.f32 %v453_v27, %v1071_v33 }
 0x57c   :  { %v492_v30 = vadd.f32 %v490_v26, %v484_v29 }
 0x57e   :  { %v839_v32 = vpop.f32.mrb[8].mxu0 }
 0x57f   :  { %v466_v37 = vpop.f32.mrb[9].mxu0  ;;  %v499_v41 = vmul.f32 %v839_v32, %v1122_v47 }
 0x580   :  { %v495_v38 = vmul.f32 %v466_v37, %v1115_v46  ;;  %v840_v39 = vpop.f32.mrb[10].mxu0 }
 0x581   :  { %v469_v40 = vpop.f32.mrb[11].mxu0  ;;  %v500_v43 = vmul.f32 %v840_v39, %v1092_v36 }
 0x582   :  { %v497_v45 = vadd.f32 %v495_v38, %v491_v28  ;;  %v496_v42 = vmul.f32 %v469_v40, %v1085_v35 }
 0x584   :  { %v501_v44 = vadd.f32 %v499_v41, %v497_v45  ;;  %v498_v34 = vadd.f32 %v496_v42, %v492_v30 }
 0x586   :  { %v502_v48 = vadd.f32 %v500_v43, %v498_v34 }
 0x588   :  { %v503_v49 = vpack.c.bf16 %v502_v48, %v501_v44 }
 0x58a   :  { %846 = vmatmul.mubr.msk.bf16.vlgmr.msra.gmra.mrb[8].mxu1 %vm26_vm0, %v503_v49 }
 0x58b   :  { %865 = vmatprep.mubr.msk.bf16.mxu1 %vm983_vm1, %v982_v7  ;;  %858 = vmatpush3.bf16.msra.mxu1 %v906_v3 }
 0x58c   :  { %859 = vmatprep.subr.bf16.mxu1 %v982_v7 }
 0x58f   :  { %860 = vmatpush3.bf16.msra.mxu1 %v907_v4 }
 0x590   :  { %861 = vmatprep.subr.bf16.mxu1 %v982_v7 }
 0x593   :  { %862 = vmatpush3.bf16.msra.mxu1 %v908_v5 }
 0x594   :  { %863 = vmatprep.subr.bf16.mxu1 %v982_v7 }
 0x597   :  { %864 = vmatpush3.bf16.msra.mxu1 %v909_v6 }
 0x65d   :  { %v557_v33 = vpop.f32.mrb[8].mxu1 }
 0x65e   :  { %v1202_v46 = vadd.f32 %v557_v33, %v1025_v0  ;;  %v847_v50 = vpop.f32.mrb[9].mxu1  ;;  %v904_v0 = vld [vmem:[%s1258_s2 + $0x4] ss:$8 sps:$4 sm:$0xff]  }
 0x65f   :  { %v560_v47 = vpop.f32.mrb[10].mxu1  ;;  %850 = vmatpush3.bf16.msra.mxu0 %v904_v0 }
 0x660   :  { %v1205_v51 = vadd.f32 %v560_v47, %v1030_v1  ;;  %v848_v35 = vpop.f32.mrb[11].mxu1  ;;  %v566_v36 = vmul.f32 %v1202_v46, %v1202_v46  ;;  %851 = vmatprep.subr.bf16.mxu0 %v982_v7  ;;  %v905_v1 = vld [vmem:[%s1258_s2 + $0x14] ss:$8 sps:$4 sm:$0xff]  }
 0x662   :  { %v568_v52 = vsel %vm26_vm0, %v566_v36, 0.0  ;;  %v567_v53 = vmul.f32 %v1205_v51, %v1205_v51 }
 0x663   :  { %569 = vadd.xlane.f32.xlu1 %v568_v52  ;;  %852 = vmatpush3.bf16.msra.mxu0 %v905_v1 }
 0x664   :  { %v571_v54 = vsel %vm26_vm0, %v567_v53, 0.0 }
 0x665   :  { %572 = vadd.xlane.f32.xlu0 %v571_v54 }
 0x6f0   :  { %v570_v31 = vpop.xlane.xlu1 %569 }
 0x6f1   :  { %v574_v55 = vmul.f32 0.03125, %v570_v31 }
 0x6f2   :  { %v573_v56 = vpop.xlane.xlu0 %572 }
 0x6f3   :  { %v576_v57 = vadd.f32 1e-05, %v574_v55  ;;  %v575_v58 = vmul.f32 0.03125, %v573_v56 }
 0x6f5   :  { %946 = vrsqrt.f32 %v576_v57  ;;  %v577_v59 = vadd.f32 1e-05, %v575_v58 }
 0x6f7   :  { %948 = vrsqrt.f32 %v577_v59 }
 0x6ff   :  { %v947_v60 = vpop.eup %946 }
 0x700   :  { %v580_v62 = vmul.f32 %v947_v60, %v1202_v46 }
 0x701   :  { %v949_v61 = vpop.eup %948 }
 0x702   :  { %v581_v63 = vmul.f32 %v949_v61, %v1205_v51 }
 0x704   :  { %v582_v2 = vpack.c.bf16 %v581_v63, %v580_v62 }
 0x706   :  { %854 = vmatmul.mubr.msk.bf16.vlgmr.msra.gmra.mrb[12].mxu0 %vm26_vm0, %v582_v2 }
 0x7d9   :  { %v636_v8 = vpop.f32.mrb[12].mxu0 }
 0x7da   :  { %659 = vrot.lane.b32.xlu0 %v636_v8, %s984_s27  ;;  %v855_v9 = vpop.f32.mrb[13].mxu0  ;;  %v782_v12 = vmul.f32 -1.442695, %v636_v8 }
 0x7db   :  { %v639_v10 = vpop.f32.mrb[14].mxu0 }
 0x7dc   :  { %661 = vrot.lane.b32.xlu1 %v639_v10, %s984_s27  ;;  %v856_v11 = vpop.f32.mrb[15].mxu0  ;;  %v783_v13 = vmul.f32 -1.442695, %v639_v10  ;;  %950 = vpow2.f32 %v782_v12  ;;  %s754_s27 = sshll.u32 %s989_s3, 4  ;;  %s755_s27 = int_to_ptr.vmem [resolvable:$true] %s754_s27 }
 0x7dd   :  { %s958_s12 = scalar_lea.vmem %s755_s27, 256  ;;  %p963_p1 = scmp.lt.s32.totalorder %s755_s27, %s755_s27 }
 0x7de   :  { %952 = vpow2.f32 %v783_v13  ;;  %p959_p0 = scmp.ne.s32.totalorder %s755_s27, %s958_s12  ;;  %p964_p2 = scmp.lt.s32.totalorder %s958_s12, %s958_s12 }
 0x7e0   :  { %p965_p3 = por %p964_p2, %p963_p1 }
 0x7e2   :  { %p966_p4 = pnand %p965_p3, %p959_p0 }
 0x7e6   :  { %v951_v14 = vpop.eup %950 }
 0x7e7   :  { %v649_v7 = vadd.f32 1.0, %v951_v14 }
 0x7e8   :  { %v953_v15 = vpop.eup %952 }
 0x7e9   :  { %v650_v16 = vadd.f32 1.0, %v953_v15  ;;  %954 = vrcp.f32 %v649_v7 }
 0x7eb   :  { %956 = vrcp.f32 %v650_v16 }
 0x7f3   :  { %v955_v17 = vpop.eup %954 }
 0x7f4   :  { %v655_v20 = vmul.f32 %v955_v17, %v636_v8 }
 0x7f5   :  { %v957_v18 = vpop.eup %956 }
 0x7f6   :  { %v656_v21 = vmul.f32 %v957_v18, %v639_v10 }
 0x84c   :  { %v660_v19 = vpop.permute.xlu0 %659 }
 0x84d   :  { %v665_v23 = vmul.f32 %v660_v19, %v655_v20 }
 0x84e   :  { %v662_v22 = vpop.permute.xlu1 %661 }
 0x84f   :  { %v666_v24 = vmul.f32 %v662_v22, %v656_v21 }
 0x851   :  { %v667_v25 = vpack.c.bf16 %v666_v24, %v665_v23 }
 0x853   :  { %866 = vmatmul.mubr.msk.bf16.vlgmr.msra.gmra.mrb[12].mxu1 %vm700_vm3, %v667_v25 }
 0x926   :  { %v738_v26 = vpop.f32.mrb[12].mxu1 }
 0x927   :  { %v745_v27 = vadd.f32 %v738_v26, %v1202_v46  ;;  %v867_v28 = vpop.f32.mrb[13].mxu1 }
 0x928   :  { %v741_v29 = vpop.f32.mrb[14].mxu1 }
 0x929   :  { %747 = vst.msk [vmem:[#allocation2] sm:$0xff] %vm26_vm0, %v745_v27  ;;  %v746_v30 = vadd.f32 %v741_v29, %v1205_v51  ;;  %v868_v32 = vpop.f32.mrb[15].mxu1 }
 0x92b   :  { %748 = vst.msk [vmem:[#allocation2 + $0x8] sm:$0xff] %vm26_vm0, %v746_v30 }
 0x92c   :  { %969 = shalt.err (!%p966_p4)
}
 0x92d   :  { %s970_s15 = scalar_lea.hbm %s1261_s5, 256 }
 0x92e   :  { %p971_p5 = scmp.ne.s32.totalorder %s1261_s5, %s970_s15  ;;  %p974_p6 = scmp.lt.u32.totalorder %s970_s15, %s1261_s5 }
 0x930   :  { %p976_p7 = pnand %p974_p6, %p971_p5 }
 0x932   :  { %979 = shalt.err (!%p976_p7)
}
 0x933   :  { %s990_s20 = smov 128   ;;  %s991_s21 = smov 8  }
 0x934   :  { %760 = dma.vmem_to_hbm [thread:$0]  %s755_s27, 256, %s1261_s5, [#allocation3], %s990_s20, %s990_s20, %s991_s21  }
 0x935   :  { %980 = dma.done.wait [#allocation3], 256  }
 0x936   :  { %981 = vsyncadd [#allocation3], 4294967040 }
 0x937   :  { %764 = vsyncpa [#allocation3], 1 }

</bundles_post_ra>
